<compile_context>
chip_gen: v7x
topology: tpu7x:2x2x1
jax: 0.10.0
libtpu: 0.0.40
codegen_flags: <defaults>
</compile_context>

<pallas_src>
import jax
import jax.numpy as jnp
from jax.experimental import pallas as pl
from jax.experimental.pallas import tpu as pltpu

INPUT_UNITS = 270
HIDDEN_UNITS1 = 128
HIDDEN_UNITS2 = 32
OUT_UNITS = 18
BN_EPS = 1e-5

# Row offsets of each weight matrix inside the packed (784, 128) weight blob.
# Every segment start is a multiple of 8 (sublane-aligned static slices).
_R_W1 = 0                        # rows   0..269 : W1 (270 x 128)
_R_W2 = 272                      # rows 272..399 : W2 (128 x 128)
_R_W3 = _R_W2 + HIDDEN_UNITS1    # rows 400..527 : W3 (128 x 128, cols 32+ zero)
_R_W4 = _R_W3 + HIDDEN_UNITS1    # rows 528..655 : W4 (padded to 128 x 128)
_R_W5 = _R_W4 + HIDDEN_UNITS1    # rows 656..783 : W5 (padded to 128 x 128)
_R_END = _R_W5 + HIDDEN_UNITS1   # 784 rows total

# Row indices inside the packed (8, 128) per-feature vector blob.
_V_G1, _V_B1, _V_G2, _V_B2, _V_G3, _V_B3, _V_BIAS4, _V_BIAS5 = range(8)


def _bn_relu(h, gamma, beta):
    """Training-mode BatchNorm1d + ReLU, one-pass statistics.

    Padded (all-zero) feature columns stay exactly zero because their
    gamma/beta padding is zero as well.
    """
    inv_n = 1.0 / h.shape[0]
    s1 = jnp.sum(h, axis=0, keepdims=True)
    s2 = jnp.sum(h * h, axis=0, keepdims=True)
    mean = s1 * inv_n
    var = jnp.maximum(s2 * inv_n - mean * mean, 0.0)   # biased variance
    inv_std = jax.lax.rsqrt(var + BN_EPS)
    return jnp.maximum((h - mean) * inv_std * gamma + beta, 0.0)


def mlp_kernel(x_ref, w_ref, v_ref, out_ref):
    x = x_ref[...]                                     # (B, 270)

    # Layer 1: Linear(270 -> 128) [bias cancels under BN] + BN + ReLU
    h = jnp.dot(x, w_ref[_R_W1:_R_W1 + INPUT_UNITS, :],
                preferred_element_type=jnp.float32)
    h = _bn_relu(h, v_ref[_V_G1:_V_G1 + 1, :], v_ref[_V_B1:_V_B1 + 1, :])

    # Layer 2: Linear(128 -> 128) [bias cancels under BN] + BN + ReLU
    h = jnp.dot(h, w_ref[_R_W2:_R_W3, :], preferred_element_type=jnp.float32)
    h = _bn_relu(h, v_ref[_V_G2:_V_G2 + 1, :], v_ref[_V_B2:_V_B2 + 1, :])

    # Layer 3: Linear(128 -> 32) [bias cancels under BN] + BN + ReLU
    # (output zero-padded to 128 lanes; padded columns remain exactly 0)
    h = jnp.dot(h, w_ref[_R_W3:_R_W4, :], preferred_element_type=jnp.float32)
    h = _bn_relu(h, v_ref[_V_G3:_V_G3 + 1, :], v_ref[_V_B3:_V_B3 + 1, :])

    # Layer 4: Linear(32 -> 32) + ReLU   (zero-padded to 128x128)
    h = jnp.dot(h, w_ref[_R_W4:_R_W5, :], preferred_element_type=jnp.float32)
    h = jnp.maximum(h + v_ref[_V_BIAS4:_V_BIAS4 + 1, :], 0.0)

    # Layer 5: Linear(32 -> 18)          (zero-padded to 128x128)
    y = jnp.dot(h, w_ref[_R_W5:_R_END, :], preferred_element_type=jnp.float32)
    y = y + v_ref[_V_BIAS5:_V_BIAS5 + 1, :]

    out_ref[...] = y[:, :OUT_UNITS].astype(out_ref.dtype)


def mlp_forward(x, w_blob, v_blob):
    B = x.shape[0]
    vmem = pl.BlockSpec(memory_space=pltpu.MemorySpace.VMEM)
    return pl.pallas_call(
        mlp_kernel,
        out_shape=jax.ShapeDtypeStruct((B, OUT_UNITS), jnp.float32),
        in_specs=[vmem, vmem, vmem],
        out_specs=vmem,
        compiler_params=pltpu.CompilerParams(vmem_limit_bytes=16 * 1024 * 1024),
    )(x, w_blob, v_blob)


def init_params(key):
    # Deterministic init matching the PyTorch module's parameter shapes.
    # Linear weights stored as (in, out) so forward is x @ W + b.
    def linear(key, fan_in, fan_out):
        kw, kb = jax.random.split(key)
        bound = 1.0 / jnp.sqrt(fan_in)
        w = jax.random.uniform(kw, (fan_in, fan_out), jnp.float32, -bound, bound)
        b = jax.random.uniform(kb, (1, fan_out), jnp.float32, -bound, bound)
        return w, b

    k1, k2, k3, k4, k5 = jax.random.split(key, 5)
    w1, b1 = linear(k1, INPUT_UNITS, HIDDEN_UNITS1)
    w2, b2 = linear(k2, HIDDEN_UNITS1, HIDDEN_UNITS1)
    w3, b3 = linear(k3, HIDDEN_UNITS1, HIDDEN_UNITS2)
    w4, b4 = linear(k4, HIDDEN_UNITS2, HIDDEN_UNITS2)
    w5, b5 = linear(k5, HIDDEN_UNITS2, OUT_UNITS)

    # BatchNorm affine params (PyTorch default init: gamma=1, beta=0).
    g1 = jnp.ones((1, HIDDEN_UNITS1), jnp.float32)
    be1 = jnp.zeros((1, HIDDEN_UNITS1), jnp.float32)
    g2 = jnp.ones((1, HIDDEN_UNITS1), jnp.float32)
    be2 = jnp.zeros((1, HIDDEN_UNITS1), jnp.float32)
    g3 = jnp.ones((1, HIDDEN_UNITS2), jnp.float32)
    be3 = jnp.zeros((1, HIDDEN_UNITS2), jnp.float32)

    return (w1, b1, g1, be1, w2, b2, g2, be2, w3, b3, g3, be3, w4, b4, w5, b5)


def pack_params(params):
    """Pack all kernel-visible parameters into 2 VMEM-friendly blobs.

    b1/b2/b3 (pre-BatchNorm biases) are intentionally dropped: they cancel
    exactly in (h - mean).  Done once, host-side, so repeated calls reuse the
    packed blobs without re-packing.
    """
    (w1, _b1, g1, be1, w2, _b2, g2, be2, w3, _b3, g3, be3, w4, b4, w5, b5) = params
    H1 = HIDDEN_UNITS1

    def pad_to(w, rows, cols):
        return jnp.pad(w, ((0, rows - w.shape[0]), (0, cols - w.shape[1])))

    w_blob = jnp.concatenate(
        [
            pad_to(w1, _R_W2 - _R_W1, H1),   # 272 x 128 (2 zero rows of padding)
            pad_to(w2, H1, H1),              # 128 x 128
            pad_to(w3, H1, H1),              # 128 x 128 (cols 32..127 zero)
            pad_to(w4, H1, H1),              # 128 x 128 (rows/cols 32.. zero)
            pad_to(w5, H1, H1),              # 128 x 128 (rows 32.., cols 18.. zero)
        ],
        axis=0,
    )                                        # (784, 128) f32 ~ 392 KiB

    def pad_vec(v):
        v = v.reshape(1, -1)
        return jnp.pad(v, ((0, 0), (0, H1 - v.shape[1])))

    v_blob = jnp.concatenate(
        [pad_vec(g1), pad_vec(be1),
         pad_vec(g2), pad_vec(be2),
         pad_vec(g3), pad_vec(be3),
         pad_vec(b4), pad_vec(b5)],
        axis=0,
    )                                        # (8, 128) f32 — exactly one vreg tile

    return w_blob, v_blob


def reference_forward(x, params):
    # Pure-JAX reference with the FULL PyTorch semantics (including the
    # pre-BN biases and two-pass variance) — validates that dropping
    # b1/b2/b3 in the kernel is exact.
    (w1, b1, g1, be1, w2, b2, g2, be2, w3, b3, g3, be3, w4, b4, w5, b5) = params

    def bn_relu(h, g, b):
        m = jnp.mean(h, axis=0, keepdims=True)
        v = jnp.mean((h - m) ** 2, axis=0, keepdims=True)
        return jnp.maximum((h - m) / jnp.sqrt(v + BN_EPS) * g + b, 0.0)

    h = bn_relu(x @ w1 + b1, g1, be1)
    h = bn_relu(h @ w2 + b2, g2, be2)
    h = bn_relu(h @ w3 + b3, g3, be3)
    h = jnp.maximum(h @ w4 + b4, 0.0)
    return h @ w5 + b5


if __name__ == "__main__":
    key = jax.random.PRNGKey(0)
    kx, kp = jax.random.split(key)

    B = 8  # small batch; BN uses full-batch (training-mode) statistics
    x = jax.random.normal(kx, (B, INPUT_UNITS), jnp.float32)
    params = init_params(kp)
    w_blob, v_blob = pack_params(params)   # packed once, reused across calls

    y = mlp_forward(x, w_blob, v_blob)
    y = jax.block_until_ready(y)

    y_ref = reference_forward(x, params)
    assert y.shape == (B, OUT_UNITS)
    assert jnp.allclose(y, y_ref, atol=1e-4, rtol=1e-4), "mismatch vs JAX reference"

    print("KERNEL_OK")
</pallas_src>

<mosaic_0001>
module attributes {stable_mosaic.version = 11 : i64} {
  func.func @mlp_kernel(%arg0: memref<8x270xf32, #tpu.memory_space<vmem>>, %arg1: memref<784x128xf32, #tpu.memory_space<vmem>>, %arg2: memref<8x128xf32, #tpu.memory_space<vmem>>, %arg3: memref<8x18xf32, #tpu.memory_space<vmem>>) attributes {dimension_semantics = [], scalar_prefetch = 0 : i64, scratch_operands = 0 : i64, tpu.core_type = #tpu.core_type<tc>} {
    %c0 = arith.constant 0 : index
    %c0_0 = arith.constant 0 : index
    %0 = vector.load %arg0[%c0, %c0_0] : memref<8x270xf32, #tpu.memory_space<vmem>>, vector<8x270xf32>
    %c0_1 = arith.constant 0 : index
    %c0_2 = arith.constant 0 : index
    %1 = vector.load %arg1[%c0_1, %c0_2] : memref<784x128xf32, #tpu.memory_space<vmem>>, vector<270x128xf32>
    %cst = arith.constant dense<0.000000e+00> : vector<8x128xf32>
    %2 = tpu.matmul %0, %1, %cst {dimension_numbers = #tpu.dot_dimension_numbers<[1], [0], [0], [1], [0, 0, 1, 1], [], []>} : vector<8x270xf32>, vector<270x128xf32>, vector<8x128xf32> -> vector<8x128xf32>
    %c0_3 = arith.constant 0 : index
    %c0_4 = arith.constant 0 : index
    %3 = vector.load %arg2[%c0_3, %c0_4] : memref<8x128xf32, #tpu.memory_space<vmem>>, vector<1x128xf32>
    %c1 = arith.constant 1 : index
    %c0_5 = arith.constant 0 : index
    %4 = vector.load %arg2[%c1, %c0_5] : memref<8x128xf32, #tpu.memory_space<vmem>>, vector<1x128xf32>
    %cst_6 = arith.constant dense<0.000000e+00> : vector<128xf32>
    %5 = vector.multi_reduction <add>, %2, %cst_6 [0] : vector<8x128xf32> to vector<128xf32>
    %6 = vector.shape_cast %5 : vector<128xf32> to vector<1x128xf32>
    %7 = arith.mulf %2, %2 : vector<8x128xf32>
    %cst_7 = arith.constant dense<0.000000e+00> : vector<128xf32>
    %8 = vector.multi_reduction <add>, %7, %cst_7 [0] : vector<8x128xf32> to vector<128xf32>
    %9 = vector.shape_cast %8 : vector<128xf32> to vector<1x128xf32>
    %cst_8 = arith.constant 1.250000e-01 : f32
    %10 = vector.broadcast %cst_8 : f32 to vector<1x128xf32>
    %11 = arith.mulf %6, %10 : vector<1x128xf32>
    %cst_9 = arith.constant 1.250000e-01 : f32
    %12 = vector.broadcast %cst_9 : f32 to vector<1x128xf32>
    %13 = arith.mulf %9, %12 : vector<1x128xf32>
    %14 = arith.mulf %11, %11 : vector<1x128xf32>
    %15 = arith.subf %13, %14 : vector<1x128xf32>
    %cst_10 = arith.constant 0.000000e+00 : f32
    %16 = vector.broadcast %cst_10 : f32 to vector<1x128xf32>
    %17 = arith.maximumf %15, %16 : vector<1x128xf32>
    %cst_11 = arith.constant 9.99999974E-6 : f32
    %18 = vector.broadcast %cst_11 : f32 to vector<1x128xf32>
    %19 = arith.addf %17, %18 : vector<1x128xf32>
    %20 = math.rsqrt %19 : vector<1x128xf32>
    %21 = vector.broadcast %11 : vector<1x128xf32> to vector<8x128xf32>
    %22 = arith.subf %2, %21 : vector<8x128xf32>
    %23 = vector.broadcast %20 : vector<1x128xf32> to vector<8x128xf32>
    %24 = arith.mulf %22, %23 : vector<8x128xf32>
    %25 = vector.broadcast %3 : vector<1x128xf32> to vector<8x128xf32>
    %26 = arith.mulf %24, %25 : vector<8x128xf32>
    %27 = vector.broadcast %4 : vector<1x128xf32> to vector<8x128xf32>
    %28 = arith.addf %26, %27 : vector<8x128xf32>
    %cst_12 = arith.constant 0.000000e+00 : f32
    %29 = vector.broadcast %cst_12 : f32 to vector<8x128xf32>
    %30 = arith.maximumf %28, %29 : vector<8x128xf32>
    %c272 = arith.constant 272 : index
    %c0_13 = arith.constant 0 : index
    %31 = vector.load %arg1[%c272, %c0_13] : memref<784x128xf32, #tpu.memory_space<vmem>>, vector<128x128xf32>
    %cst_14 = arith.constant dense<0.000000e+00> : vector<8x128xf32>
    %32 = tpu.matmul %30, %31, %cst_14 {dimension_numbers = #tpu.dot_dimension_numbers<[1], [0], [0], [1], [0, 0, 1, 1], [], []>} : vector<8x128xf32>, vector<128x128xf32>, vector<8x128xf32> -> vector<8x128xf32>
    %c2 = arith.constant 2 : index
    %c0_15 = arith.constant 0 : index
    %33 = vector.load %arg2[%c2, %c0_15] : memref<8x128xf32, #tpu.memory_space<vmem>>, vector<1x128xf32>
    %c3 = arith.constant 3 : index
    %c0_16 = arith.constant 0 : index
    %34 = vector.load %arg2[%c3, %c0_16] : memref<8x128xf32, #tpu.memory_space<vmem>>, vector<1x128xf32>
    %cst_17 = arith.constant dense<0.000000e+00> : vector<128xf32>
    %35 = vector.multi_reduction <add>, %32, %cst_17 [0] : vector<8x128xf32> to vector<128xf32>
    %36 = vector.shape_cast %35 : vector<128xf32> to vector<1x128xf32>
    %37 = arith.mulf %32, %32 : vector<8x128xf32>
    %cst_18 = arith.constant dense<0.000000e+00> : vector<128xf32>
    %38 = vector.multi_reduction <add>, %37, %cst_18 [0] : vector<8x128xf32> to vector<128xf32>
    %39 = vector.shape_cast %38 : vector<128xf32> to vector<1x128xf32>
    %cst_19 = arith.constant 1.250000e-01 : f32
    %40 = vector.broadcast %cst_19 : f32 to vector<1x128xf32>
    %41 = arith.mulf %36, %40 : vector<1x128xf32>
    %cst_20 = arith.constant 1.250000e-01 : f32
    %42 = vector.broadcast %cst_20 : f32 to vector<1x128xf32>
    %43 = arith.mulf %39, %42 : vector<1x128xf32>
    %44 = arith.mulf %41, %41 : vector<1x128xf32>
    %45 = arith.subf %43, %44 : vector<1x128xf32>
    %cst_21 = arith.constant 0.000000e+00 : f32
    %46 = vector.broadcast %cst_21 : f32 to vector<1x128xf32>
    %47 = arith.maximumf %45, %46 : vector<1x128xf32>
    %cst_22 = arith.constant 9.99999974E-6 : f32
    %48 = vector.broadcast %cst_22 : f32 to vector<1x128xf32>
    %49 = arith.addf %47, %48 : vector<1x128xf32>
    %50 = math.rsqrt %49 : vector<1x128xf32>
    %51 = vector.broadcast %41 : vector<1x128xf32> to vector<8x128xf32>
    %52 = arith.subf %32, %51 : vector<8x128xf32>
    %53 = vector.broadcast %50 : vector<1x128xf32> to vector<8x128xf32>
    %54 = arith.mulf %52, %53 : vector<8x128xf32>
    %55 = vector.broadcast %33 : vector<1x128xf32> to vector<8x128xf32>
    %56 = arith.mulf %54, %55 : vector<8x128xf32>
    %57 = vector.broadcast %34 : vector<1x128xf32> to vector<8x128xf32>
    %58 = arith.addf %56, %57 : vector<8x128xf32>
    %cst_23 = arith.constant 0.000000e+00 : f32
    %59 = vector.broadcast %cst_23 : f32 to vector<8x128xf32>
    %60 = arith.maximumf %58, %59 : vector<8x128xf32>
    %c400 = arith.constant 400 : index
    %c0_24 = arith.constant 0 : index
    %61 = vector.load %arg1[%c400, %c0_24] : memref<784x128xf32, #tpu.memory_space<vmem>>, vector<128x128xf32>
    %cst_25 = arith.constant dense<0.000000e+00> : vector<8x128xf32>
    %62 = tpu.matmul %60, %61, %cst_25 {dimension_numbers = #tpu.dot_dimension_numbers<[1], [0], [0], [1], [0, 0, 1, 1], [], []>} : vector<8x128xf32>, vector<128x128xf32>, vector<8x128xf32> -> vector<8x128xf32>
    %c4 = arith.constant 4 : index
    %c0_26 = arith.constant 0 : index
    %63 = vector.load %arg2[%c4, %c0_26] : memref<8x128xf32, #tpu.memory_space<vmem>>, vector<1x128xf32>
    %c5 = arith.constant 5 : index
    %c0_27 = arith.constant 0 : index
    %64 = vector.load %arg2[%c5, %c0_27] : memref<8x128xf32, #tpu.memory_space<vmem>>, vector<1x128xf32>
    %cst_28 = arith.constant dense<0.000000e+00> : vector<128xf32>
    %65 = vector.multi_reduction <add>, %62, %cst_28 [0] : vector<8x128xf32> to vector<128xf32>
    %66 = vector.shape_cast %65 : vector<128xf32> to vector<1x128xf32>
    %67 = arith.mulf %62, %62 : vector<8x128xf32>
    %cst_29 = arith.constant dense<0.000000e+00> : vector<128xf32>
    %68 = vector.multi_reduction <add>, %67, %cst_29 [0] : vector<8x128xf32> to vector<128xf32>
    %69 = vector.shape_cast %68 : vector<128xf32> to vector<1x128xf32>
    %cst_30 = arith.constant 1.250000e-01 : f32
    %70 = vector.broadcast %cst_30 : f32 to vector<1x128xf32>
    %71 = arith.mulf %66, %70 : vector<1x128xf32>
    %cst_31 = arith.constant 1.250000e-01 : f32
    %72 = vector.broadcast %cst_31 : f32 to vector<1x128xf32>
    %73 = arith.mulf %69, %72 : vector<1x128xf32>
    %74 = arith.mulf %71, %71 : vector<1x128xf32>
    %75 = arith.subf %73, %74 : vector<1x128xf32>
    %cst_32 = arith.constant 0.000000e+00 : f32
    %76 = vector.broadcast %cst_32 : f32 to vector<1x128xf32>
    %77 = arith.maximumf %75, %76 : vector<1x128xf32>
    %cst_33 = arith.constant 9.99999974E-6 : f32
    %78 = vector.broadcast %cst_33 : f32 to vector<1x128xf32>
    %79 = arith.addf %77, %78 : vector<1x128xf32>
    %80 = math.rsqrt %79 : vector<1x128xf32>
    %81 = vector.broadcast %71 : vector<1x128xf32> to vector<8x128xf32>
    %82 = arith.subf %62, %81 : vector<8x128xf32>
    %83 = vector.broadcast %80 : vector<1x128xf32> to vector<8x128xf32>
    %84 = arith.mulf %82, %83 : vector<8x128xf32>
    %85 = vector.broadcast %63 : vector<1x128xf32> to vector<8x128xf32>
    %86 = arith.mulf %84, %85 : vector<8x128xf32>
    %87 = vector.broadcast %64 : vector<1x128xf32> to vector<8x128xf32>
    %88 = arith.addf %86, %87 : vector<8x128xf32>
    %cst_34 = arith.constant 0.000000e+00 : f32
    %89 = vector.broadcast %cst_34 : f32 to vector<8x128xf32>
    %90 = arith.maximumf %88, %89 : vector<8x128xf32>
    %c528 = arith.constant 528 : index
    %c0_35 = arith.constant 0 : index
    %91 = vector.load %arg1[%c528, %c0_35] : memref<784x128xf32, #tpu.memory_space<vmem>>, vector<128x128xf32>
    %cst_36 = arith.constant dense<0.000000e+00> : vector<8x128xf32>
    %92 = tpu.matmul %90, %91, %cst_36 {dimension_numbers = #tpu.dot_dimension_numbers<[1], [0], [0], [1], [0, 0, 1, 1], [], []>} : vector<8x128xf32>, vector<128x128xf32>, vector<8x128xf32> -> vector<8x128xf32>
    %c6 = arith.constant 6 : index
    %c0_37 = arith.constant 0 : index
    %93 = vector.load %arg2[%c6, %c0_37] : memref<8x128xf32, #tpu.memory_space<vmem>>, vector<1x128xf32>
    %94 = vector.broadcast %93 : vector<1x128xf32> to vector<8x128xf32>
    %95 = arith.addf %92, %94 : vector<8x128xf32>
    %cst_38 = arith.constant 0.000000e+00 : f32
    %96 = vector.broadcast %cst_38 : f32 to vector<8x128xf32>
    %97 = arith.maximumf %95, %96 : vector<8x128xf32>
    %c656 = arith.constant 656 : index
    %c0_39 = arith.constant 0 : index
    %98 = vector.load %arg1[%c656, %c0_39] : memref<784x128xf32, #tpu.memory_space<vmem>>, vector<128x128xf32>
    %cst_40 = arith.constant dense<0.000000e+00> : vector<8x128xf32>
    %99 = tpu.matmul %97, %98, %cst_40 {dimension_numbers = #tpu.dot_dimension_numbers<[1], [0], [0], [1], [0, 0, 1, 1], [], []>} : vector<8x128xf32>, vector<128x128xf32>, vector<8x128xf32> -> vector<8x128xf32>
    %c7 = arith.constant 7 : index
    %c0_41 = arith.constant 0 : index
    %100 = vector.load %arg2[%c7, %c0_41] : memref<8x128xf32, #tpu.memory_space<vmem>>, vector<1x128xf32>
    %101 = vector.broadcast %100 : vector<1x128xf32> to vector<8x128xf32>
    %102 = arith.addf %99, %101 : vector<8x128xf32>
    %103 = vector.extract_strided_slice %102 {offsets = [0, 0], sizes = [8, 18], strides = [1, 1]} : vector<8x128xf32> to vector<8x18xf32>
    %c0_42 = arith.constant 0 : index
    %c0_43 = arith.constant 0 : index
    %104 = vector.load %arg3[%c0_42, %c0_43] : memref<8x18xf32, #tpu.memory_space<vmem>>, vector<8x18xf32>
    tpu.vector_store %arg3[%c0_42, %c0_43], %103 {strides = array<i32>} : memref<8x18xf32, #tpu.memory_space<vmem>>, vector<8x18xf32>,
    return
  }
}

</mosaic_0001>

<bundles_post_ra>
// kernel: tpu_custom_call.1
= control target key start
LH: loop header
LB: loop body
LE: loop exit
PB: predicated region body
PF: predicated region fallthrough
CT: control target
= control target key end

     0   :  { %8 = vsyncpa [#allocation3], 0  ;;  %s1341_s0 = inlined_call_operand.hbm [shape: f32[8,270], index: 0, kind: input, shape index: {}]   ;;  %s1342_s1 = inlined_call_operand.hbm [shape: f32[784,128], index: 1, kind: input, shape index: {}]   ;;  %s1343_s2 = inlined_call_operand.hbm [shape: f32[8,128], index: 2, kind: input, shape index: {}]   ;;  %s1344_s3 = inlined_call_operand.hbm [shape: f32[8,18], index: 3, kind: output, shape index: {}]  }
   0x1   :  { %9 = vsyncpa [#allocation6], 0 }
   0x2   :  { %10 = vsyncpa [#allocation4], 0  ;;  %s1220_s12 = smov [#allocation5]   ;;  %s1126_s16 = scalar_lea.hbm %s1342_s1, 12544 }
   0x3   :  { %s26_s13 = sshll.u32 %s1220_s12, 4  ;;  %p1127_p0 = scmp.ne.s32.totalorder %s1342_s1, %s1126_s16  ;;  %s27_s13 = int_to_ptr.vmem [resolvable:$true] %s26_s13 }
   0x4   :  { %p1130_p1 = scmp.lt.u32.totalorder %s1126_s16, %s1342_s1 }
   0x6   :  { %p1132_p2 = pnand %p1130_p1, %p1127_p0 }
   0x8   :  { %1135 = shalt.err (!%p1132_p2)
}
   0x9   :  { %s1136_s21 = scalar_lea.vmem %s27_s13, 12544  ;;  %p1141_p4 = scmp.lt.s32.totalorder %s27_s13, %s27_s13 }
   0xa   :  { %p1137_p3 = scmp.ne.s32.totalorder %s27_s13, %s1136_s21  ;;  %p1142_p5 = scmp.lt.s32.totalorder %s1136_s21, %s1136_s21 }
   0xc   :  { %p1143_p6 = por %p1142_p5, %p1141_p4 }
   0xe   :  { %p1144_p7 = pnand %p1143_p6, %p1137_p3 }
  0x10   :  { %1147 = shalt.err (!%p1144_p7)
}
  0x11   :  { %s1221_s22 = smov 128   ;;  %s1222_s23 = smov 8  }
  0x12   :  { %32 = dma.hbm_to_vmem [thread:$0]  %s1342_s1, 12544, %s27_s13, [#allocation6], %s1221_s22, %s1221_s22, %s1222_s23  }
  0x13   :  { %s1223_s26 = smov [#allocation2]   ;;  %s1224_s28 = smov [#allocation7]  }
  0x14   :  { %s17_s27 = sshll.u32 %s1223_s26, 4  ;;  %s39_s29 = sshll.u32 %s1224_s28, 4  ;;  %s18_s27 = int_to_ptr.vmem [resolvable:$true] %s17_s27  ;;  %s40_s29 = int_to_ptr.vmem [resolvable:$true] %s39_s29 }
  0x15   :  { %s1148_s5 = scalar_lea.hbm %s1341_s0, 384 }
  0x16   :  { %p1149_p8 = scmp.ne.s32.totalorder %s1341_s0, %s1148_s5  ;;  %p1152_p9 = scmp.lt.u32.totalorder %s1148_s5, %s1341_s0 }
  0x18   :  { %p1154_p10 = pnand %p1152_p9, %p1149_p8 }
  0x1a   :  { %1157 = shalt.err (!%p1154_p10)
}
  0x1b   :  { %s1158_s1 = scalar_lea.vmem %s18_s27, 384  ;;  %p1163_p12 = scmp.lt.s32.totalorder %s18_s27, %s18_s27 }
  0x1c   :  { %p1159_p11 = scmp.ne.s32.totalorder %s18_s27, %s1158_s1  ;;  %p1164_p13 = scmp.lt.s32.totalorder %s1158_s1, %s1158_s1 }
  0x1e   :  { %p1165_p0 = por %p1164_p13, %p1163_p12 }
  0x20   :  { %p1166_p1 = pnand %p1165_p0, %p1159_p11 }
  0x22   :  { %1169 = shalt.err (!%p1166_p1)
}
  0x23   :  { %20 = dma.hbm_to_vmem [thread:$0]  %s1341_s0, 384, %s18_s27, [#allocation3]  }
  0x24   :  { %s1170_s14 = scalar_lea.hbm %s1343_s2, 128 }
  0x25   :  { %p1171_p2 = scmp.ne.s32.totalorder %s1343_s2, %s1170_s14  ;;  %p1174_p3 = scmp.lt.u32.totalorder %s1170_s14, %s1343_s2 }
  0x27   :  { %p1176_p4 = pnand %p1174_p3, %p1171_p2 }
  0x29   :  { %1179 = shalt.err (!%p1176_p4)
}
  0x2a   :  { %s1180_s19 = scalar_lea.vmem %s40_s29, 128  ;;  %p1185_p6 = scmp.lt.s32.totalorder %s40_s29, %s40_s29 }
  0x2b   :  { %p1181_p5 = scmp.ne.s32.totalorder %s40_s29, %s1180_s19  ;;  %p1186_p7 = scmp.lt.s32.totalorder %s1180_s19, %s1180_s19 }
  0x2d   :  { %p1187_p8 = por %p1186_p7, %p1185_p6 }
  0x2f   :  { %p1188_p9 = pnand %p1187_p8, %p1181_p5 }
  0x31   :  { %1191 = shalt.err (!%p1188_p9)
}
  0x32   :  { %42 = dma.hbm_to_vmem [thread:$0]  %s1343_s2, 128, %s40_s29, [#allocation6]  }
  0x33   :  { %1214 = dma.done.wait [#allocation3], 384  }
  0x34   :  { %1215 = vsyncadd [#allocation3], 4294966912 }
  0x35   :  { %1216 = dma.done.wait [#allocation6], 12672  }
  0x36   :  { %1217 = vsyncadd [#allocation6], 4294954624  ;;  %v1225_v0 = vmov 0.0|0.0   ;;  %vm1226_vm0 = vmmov 0   ;;  %v1227_v1 = vmov 0.0   ;;  %v71_v2 = vld [vmem:[#allocation5 + $0x80] sm:$0xff] }
  0x37   :  { %1010 = vmatprep.subr.bf16.mxu1 %v1225_v0  ;;  %835 = vmatprep.mubr.msk.f32.mxu1 %vm1226_vm0, %v1227_v1  ;;  %v72_v3 = vld [vmem:[#allocation5 + $0x88] sm:$0xff]  ;;  %v55_v4 = vld [vmem:[#allocation5] sm:$0xff]  ;;  %v73_v7 = vld [vmem:[#allocation5 + $0x90] sm:$0xff]  ;;  %vm93_vm1 = vcmask 1045504   ;;  %vm1228_vm2 = vmmov 1   ;;  %vm89_vm4 = vcmask 113664  }
  0x38   :  { %v978_v5 = vpack.c.bf16 %v72_v3, %v71_v2  ;;  %v56_v6 = vld [vmem:[#allocation5 + $0x8] sm:$0xff]  ;;  %v74_v8 = vld [vmem:[#allocation5 + $0x98] sm:$0xff]  ;;  %v57_v11 = vld [vmem:[#allocation5 + $0x10] sm:$0xff]  ;;  %s1229_s2 = smov [#allocation8]   ;;  %vm697_vm5 = vcmask 146432  }
  0x39   :  { %v980_v9 = vpack.c.bf16 %v56_v6, %v55_v4  ;;  %v982_v10 = vpack.c.bf16 %v74_v8, %v73_v7  ;;  %v58_v12 = vld [vmem:[#allocation5 + $0x18] sm:$0xff]  ;;  %v75_v13 = vld [vmem:[#allocation5 + $0xa0] sm:$0xff]  ;;  %v76_v14 = vld [vmem:[#allocation5 + $0xa8] sm:$0xff]  ;;  %s705_s21 = sshll.u32 %s1229_s2, 4  ;;  %s706_s21 = int_to_ptr.vmem [resolvable:$true] %s705_s21 }
  0x3a   :  { %979 = vmatprep.subr.bf16.mxu0 %v978_v5  ;;  %v984_v15 = vpack.c.bf16 %v58_v12, %v57_v11  ;;  %v986_v16 = vpack.c.bf16 %v76_v14, %v75_v13  ;;  %v59_v17 = vld [vmem:[#allocation5 + $0x20] sm:$0xff]  ;;  %v60_v18 = vld [vmem:[#allocation5 + $0x28] sm:$0xff]  ;;  %v77_v19 = vld [vmem:[#allocation5 + $0xb0] sm:$0xff]  ;;  %s1192_s22 = scalar_lea.vmem %s706_s21, 128  ;;  %p1197_p11 = scmp.lt.s32.totalorder %s706_s21, %s706_s21 }
  0x3b   :  { %981 = vmatpush3.bf16.msra.mxu0 %v980_v9  ;;  %v78_v20 = vld [vmem:[#allocation5 + $0xb8] sm:$0xff]  ;;  %v988_v21 = vpack.c.bf16 %v60_v18, %v59_v17  ;;  %v61_v23 = vld [vmem:[#allocation5 + $0x30] sm:$0xff]  ;;  %v79_v25 = vld [vmem:[#allocation5 + $0xc0] sm:$0xff]  ;;  %p1193_p10 = scmp.ne.s32.totalorder %s706_s21, %s1192_s22  ;;  %p1198_p12 = scmp.lt.s32.totalorder %s1192_s22, %s1192_s22 }
  0x3c   :  { %983 = vmatprep.subr.bf16.mxu0 %v982_v10  ;;  %v990_v22 = vpack.c.bf16 %v78_v20, %v77_v19  ;;  %v62_v24 = vld [vmem:[#allocation5 + $0x38] sm:$0xff]  ;;  %v80_v26 = vld [vmem:[#allocation5 + $0xc8] sm:$0xff]  ;;  %v53_v27 = vld [vmem:[#allocation2 + $0x8] sm:$0xff] }
  0x3d   :  { %161 = vmatprep.mubr.f32.mxu0 %v53_v27  ;;  %v87_v28 = vld [vmem:[#allocation5 + $0x100] sm:$0xff]  ;;  %v88_v29 = vld [vmem:[#allocation5 + $0x108] sm:$0x3f]  ;;  %vm1012_vm3 = vmpackc.low %vm93_vm1, %vm1228_vm2  ;;  %v992_v30 = vpack.c.bf16 %v62_v24, %v61_v23  ;;  %v994_v32 = vpack.c.bf16 %v80_v26, %v79_v25  ;;  %p1199_p13 = por %p1198_p12, %p1197_p11 }
  0x3e   :  { %v1011_v31 = vpack.c.bf16 %v88_v29, %v87_v28  ;;  %v63_v33 = vld [vmem:[#allocation5 + $0x40] sm:$0xff]  ;;  %v64_v34 = vld [vmem:[#allocation5 + $0x48] sm:$0xff]  ;;  %v81_v35 = vld [vmem:[#allocation5 + $0xd0] sm:$0xff] }
  0x3f   :  { %985 = vmatpush3.bf16.msra.mxu0 %v984_v15  ;;  %v82_v36 = vld [vmem:[#allocation5 + $0xd8] sm:$0xff]  ;;  %v996_v38 = vpack.c.bf16 %v64_v34, %v63_v33  ;;  %v65_v40 = vld [vmem:[#allocation5 + $0x50] sm:$0xff]  ;;  %v83_v42 = vld [vmem:[#allocation5 + $0xe0] sm:$0xff]  ;;  %p1200_p0 = pnand %p1199_p13, %p1193_p10 }
  0x40   :  { %987 = vmatprep.subr.bf16.mxu0 %v986_v16  ;;  %1013 = vmatpush3.bf16.msk.msra.mxu1 %vm1012_vm3, %v1011_v31  ;;  %v54_v37 = vld [vmem:[#allocation2 + $0x10] sm:$0xff]  ;;  %v998_v39 = vpack.c.bf16 %v82_v36, %v81_v35  ;;  %v84_v43 = vld [vmem:[#allocation5 + $0xe8] sm:$0xff]  ;;  %v67_v46 = vld [vmem:[#allocation5 + $0x60] sm:$0xff] }
  0x41   :  { %1014 = vmatprep.subr.bf16.mxu1 %v1225_v0  ;;  %v66_v41 = vld [vmem:[#allocation5 + $0x58] sm:$0xff]  ;;  %v1002_v45 = vpack.c.bf16 %v84_v43, %v83_v42  ;;  %v68_v47 = vld [vmem:[#allocation5 + $0x68] sm:$0xff]  ;;  %v85_v48 = vld [vmem:[#allocation5 + $0xf0] sm:$0xff] }
  0x42   :  { %v1000_v44 = vpack.c.bf16 %v66_v41, %v65_v40  ;;  %v86_v49 = vld [vmem:[#allocation5 + $0xf8] sm:$0xff]  ;;  %v1004_v50 = vpack.c.bf16 %v68_v47, %v67_v46  ;;  %v69_v52 = vld [vmem:[#allocation5 + $0x70] sm:$0xff]  ;;  %v52_v55 = vld [vmem:[#allocation2] sm:$0xff] }
  0x43   :  { %989 = vmatpush3.bf16.msra.mxu0 %v988_v21  ;;  %836 = vmatmul.mubr.msk.f32.vlgmr.msra.gmra.mrb[0].mxu1 %vm89_vm4, %v54_v37  ;;  %v1006_v51 = vpack.c.bf16 %v86_v49, %v85_v48  ;;  %v70_v53 = vld [vmem:[#allocation5 + $0x78] sm:$0xff]  ;;  %v272_v56 = vld [vmem:[#allocation5 + $0x110] sm:$0xff]  ;;  %v274_v59 = vld [vmem:[#allocation5 + $0x120] sm:$0xff] }
  0x44   :  { %991 = vmatprep.subr.bf16.mxu0 %v990_v22  ;;  %870 = vmatprep.mubr.msk.f32.mxu1 %vm1226_vm0, %v1227_v1  ;;  %v1008_v54 = vpack.c.bf16 %v70_v53, %v69_v52  ;;  %v273_v57 = vld [vmem:[#allocation5 + $0x118] sm:$0xff]  ;;  %v275_v60 = vld [vmem:[#allocation5 + $0x128] sm:$0xff]  ;;  %v276_v62 = vld [vmem:[#allocation5 + $0x130] sm:$0xff] }
  0x45   :  { %v1015_v58 = vpack.c.bf16 %v273_v57, %v272_v56  ;;  %v1018_v61 = vpack.c.bf16 %v275_v60, %v274_v59  ;;  %v277_v63 = vld [vmem:[#allocation5 + $0x138] sm:$0xff]  ;;  %v278_v3 = vld [vmem:[#allocation5 + $0x140] sm:$0xff]  ;;  %v279_v4 = vld [vmem:[#allocation5 + $0x148] sm:$0xff] }
  0x46   :  { %v1021_v2 = vpack.c.bf16 %v277_v63, %v276_v62  ;;  %v1024_v5 = vpack.c.bf16 %v279_v4, %v278_v3  ;;  %v280_v6 = vld [vmem:[#allocation5 + $0x150] sm:$0xff]  ;;  %v281_v7 = vld [vmem:[#allocation5 + $0x158] sm:$0xff]  ;;  %v282_v9 = vld [vmem:[#allocation5 + $0x160] sm:$0xff] }
  0x47   :  { %993 = vmatpush3.bf16.msra.mxu0 %v992_v30  ;;  %1016 = vmatpush3.bf16.msra.mxu1 %v1015_v58  ;;  %v1027_v8 = vpack.c.bf16 %v281_v7, %v280_v6  ;;  %v283_v10 = vld [vmem:[#allocation5 + $0x168] sm:$0xff]  ;;  %v284_v12 = vld [vmem:[#allocation5 + $0x170] sm:$0xff]  ;;  %v285_v13 = vld [vmem:[#allocation5 + $0x178] sm:$0xff] }
  0x48   :  { %995 = vmatprep.subr.bf16.mxu0 %v994_v32  ;;  %1017 = vmatprep.subr.bf16.mxu1 %v1225_v0  ;;  %v1030_v11 = vpack.c.bf16 %v283_v10, %v282_v9  ;;  %v1033_v14 = vpack.c.bf16 %v285_v13, %v284_v12  ;;  %v286_v15 = vld [vmem:[#allocation5 + $0x180] sm:$0xff]  ;;  %v287_v16 = vld [vmem:[#allocation5 + $0x188] sm:$0xff]  ;;  %v718_v47 = vld [vmem:[#allocation7 + $0x1] ss:$0 sm:$0xff] }
  0x49   :  { %v1036_v17 = vpack.c.bf16 %v287_v16, %v286_v15  ;;  %v394_v52 = vld [vmem:[#allocation5 + $0x198] sm:$0xff]  ;;  %v397_v57 = vld [vmem:[#allocation5 + $0x1b0] sm:$0xff]  ;;  %v399_v60 = vld [vmem:[#allocation5 + $0x1c0] sm:$0xff] }
  0x4a   :  { %v398_v58 = vld [vmem:[#allocation5 + $0x1b8] sm:$0xff]  ;;  %v401_v63 = vld [vmem:[#allocation5 + $0x1d0] sm:$0xff]  ;;  %v403_v4 = vld [vmem:[#allocation5 + $0x1e0] sm:$0xff] }
  0x4b   :  { %997 = vmatpush3.bf16.msra.mxu0 %v996_v38  ;;  %1019 = vmatpush3.bf16.msra.mxu1 %v1018_v61  ;;  %v1045_v59 = vpack.c.bf16 %v398_v58, %v397_v57  ;;  %v400_v61 = vld [vmem:[#allocation5 + $0x1c8] sm:$0xff]  ;;  %v405_v7 = vld [vmem:[#allocation5 + $0x1f0] sm:$0xff]  ;;  %v407_v10 = vld [vmem:[#allocation5 + $0x200] sm:$0xff] }
  0x4c   :  { %999 = vmatprep.subr.bf16.mxu0 %v998_v39  ;;  %1020 = vmatprep.subr.bf16.mxu1 %v1225_v0  ;;  %v1048_v62 = vpack.c.bf16 %v400_v61, %v399_v60  ;;  %v525_v57 = vld [vmem:[#allocation5 + $0x268] sm:$0xff]  ;;  %v527_v60 = vld [vmem:[#allocation5 + $0x278] sm:$0xff] }
  0x4f   :  { %1001 = vmatpush3.bf16.msra.mxu0 %v1000_v44  ;;  %1022 = vmatpush3.bf16.msra.mxu1 %v1021_v2  ;;  %v402_v2 = vld [vmem:[#allocation5 + $0x1d8] sm:$0xff] }
  0x50   :  { %1003 = vmatprep.subr.bf16.mxu0 %v1002_v45  ;;  %1023 = vmatprep.subr.bf16.mxu1 %v1225_v0  ;;  %v717_v45 = vld [vmem:[#allocation7] ss:$0 sm:$0xff]  ;;  %v1051_v3 = vpack.c.bf16 %v402_v2, %v401_v63  ;;  %v529_v63 = vld [vmem:[#allocation5 + $0x288] sm:$0xff] }
  0x53   :  { %1005 = vmatpush3.bf16.msra.mxu0 %v1004_v50  ;;  %1025 = vmatpush3.bf16.msra.mxu1 %v1024_v5  ;;  %v404_v5 = vld [vmem:[#allocation5 + $0x1e8] sm:$0xff] }
  0x54   :  { %1007 = vmatprep.subr.bf16.mxu0 %v1006_v51  ;;  %1026 = vmatprep.subr.bf16.mxu1 %v1225_v0  ;;  %v393_v51 = vld [vmem:[#allocation5 + $0x190] sm:$0xff]  ;;  %v1054_v6 = vpack.c.bf16 %v404_v5, %v403_v4  ;;  %v607_v4 = vld [vmem:[#allocation5 + $0x298] sm:$0xff]  ;;  %v608_v5 = vld [vmem:[#allocation5 + $0x2a0] sm:$0xff] }
  0x55   :  { %v1039_v53 = vpack.c.bf16 %v394_v52, %v393_v51  ;;  %v520_v51 = vld [vmem:[#allocation5 + $0x240] sm:$0xff] }
  0x57   :  { %1009 = vmatpush3.bf16.msra.mxu0 %v1008_v54  ;;  %1028 = vmatpush3.bf16.msra.mxu1 %v1027_v8  ;;  %v395_v54 = vld [vmem:[#allocation5 + $0x1a0] sm:$0xff]  ;;  %v406_v8 = vld [vmem:[#allocation5 + $0x1f8] sm:$0xff] }
  0x58   :  { %1038 = vmatprep.subr.bf16.mxu0 %v1225_v0  ;;  %1029 = vmatprep.subr.bf16.mxu1 %v1225_v0  ;;  %v1057_v9 = vpack.c.bf16 %v406_v8, %v405_v7  ;;  %v609_v7 = vld [vmem:[#allocation5 + $0x2a8] sm:$0xff] }
  0x59   :  { %v1090_v8 = vpack.c.bf16 %v609_v7, %v608_v5 }
  0x5a   :  { %162 = vmatmul.mubr.f32.vlgmr.msra.gmra.mrb[0].mxu0 %v52_v55  ;;  %v396_v55 = vld [vmem:[#allocation5 + $0x1a8] sm:$0xff] }
  0x5b   :  { %905 = vmatprep.mubr.msk.f32.mxu0 %vm1226_vm0, %v1227_v1  ;;  %1031 = vmatpush3.bf16.msra.mxu1 %v1030_v11  ;;  %v1042_v56 = vpack.c.bf16 %v396_v55, %v395_v54  ;;  %v408_v11 = vld [vmem:[#allocation5 + $0x208] sm:$0xff]  ;;  %v523_v54 = vld [vmem:[#allocation5 + $0x258] sm:$0xff] }
  0x5c   :  { %1032 = vmatprep.subr.bf16.mxu1 %v1225_v0  ;;  %1040 = vmatpush3.bf16.msra.mxu0 %v1039_v53  ;;  %v1060_v12 = vpack.c.bf16 %v408_v11, %v407_v10  ;;  %v522_v53 = vld [vmem:[#allocation5 + $0x250] sm:$0xff]  ;;  %v611_v10 = vld [vmem:[#allocation5 + $0x2b8] sm:$0xff] }
  0x5d   :  { %1041 = vmatprep.subr.bf16.mxu0 %v1225_v0  ;;  %v1075_v55 = vpack.c.bf16 %v523_v54, %v522_v53  ;;  %v723_v54 = vld [vmem:[#allocation7 + $0x6] ss:$0 sm:$0xff] }
  0x5f   :  { %1034 = vmatpush3.bf16.msra.mxu1 %v1033_v14 }
  0x60   :  { %1035 = vmatprep.subr.bf16.mxu1 %v1225_v0  ;;  %1043 = vmatpush3.bf16.msra.mxu0 %v1042_v56  ;;  %v524_v56 = vld [vmem:[#allocation5 + $0x260] sm:$0xff] }
  0x61   :  { %1044 = vmatprep.subr.bf16.mxu0 %v1225_v0  ;;  %v1078_v58 = vpack.c.bf16 %v525_v57, %v524_v56 }
  0x63   :  { %1037 = vmatpush3.bf16.msra.mxu1 %v1036_v17 }
  0x64   :  { %1062 = vmatprep.subr.bf16.mxu1 %v1225_v0  ;;  %1046 = vmatpush3.bf16.msra.mxu0 %v1045_v59  ;;  %v526_v59 = vld [vmem:[#allocation5 + $0x270] sm:$0xff] }
  0x65   :  { %1047 = vmatprep.subr.bf16.mxu0 %v1225_v0  ;;  %v1081_v61 = vpack.c.bf16 %v527_v60, %v526_v59  ;;  %v724_v59 = vld [vmem:[#allocation7 + $0x7] ss:$0 sm:$0xff] }
  0x68   :  { %1049 = vmatpush3.bf16.msra.mxu0 %v1048_v62  ;;  %v528_v62 = vld [vmem:[#allocation5 + $0x280] sm:$0xff] }
  0x69   :  { %1050 = vmatprep.subr.bf16.mxu0 %v1225_v0  ;;  %v1084_v2 = vpack.c.bf16 %v529_v63, %v528_v62 }
  0x6c   :  { %1052 = vmatpush3.bf16.msra.mxu0 %v1051_v3  ;;  %v606_v3 = vld [vmem:[#allocation5 + $0x290] sm:$0xff] }
  0x6d   :  { %1053 = vmatprep.subr.bf16.mxu0 %v1225_v0 }
  0x70   :  { %1055 = vmatpush3.bf16.msra.mxu0 %v1054_v6  ;;  %v1087_v6 = vpack.c.bf16 %v607_v4, %v606_v3 }
  0x71   :  { %1056 = vmatprep.subr.bf16.mxu0 %v1225_v0 }
  0x74   :  { %1058 = vmatpush3.bf16.msra.mxu0 %v1057_v9  ;;  %v610_v9 = vld [vmem:[#allocation5 + $0x2b0] sm:$0xff] }
  0x75   :  { %1059 = vmatprep.subr.bf16.mxu0 %v1225_v0  ;;  %v1093_v11 = vpack.c.bf16 %v611_v10, %v610_v9 }
  0x78   :  { %1061 = vmatpush3.bf16.msra.mxu0 %v1060_v12  ;;  %v612_v12 = vld [vmem:[#allocation5 + $0x2c0] sm:$0xff] }
  0x79   :  { %1086 = vmatprep.subr.bf16.mxu0 %v1225_v0 }
 0x116   :  { %v233_v18 = vpop.f32.mrb[0].mxu1 }
 0x117   :  { %v837_v19 = vpop.f32.mrb[1].mxu1 }
 0x12d   :  { %v757_v20 = vpop.f32.mrb[0].mxu0 }
 0x12e   :  { %v758_v21 = vpop.f32.mrb[1].mxu0 }
 0x12f   :  { %v759_v22 = vadd.f32 %v758_v21, %v757_v20 }
 0x131   :  { %v234_v23 = vadd.f32 %v759_v22, %v233_v18 }
 0x133   :  { %v239_v24 = vrot.slane %v234_v23, 4  ;;  %v245_v25 = vmul.f32 %v234_v23, %v234_v23 }
 0x135   :  { %v240_v26 = vadd.f32 %v239_v24, %v234_v23  ;;  %v246_v27 = vrot.slane %v245_v25, 4 }
 0x137   :  { %v241_v28 = vrot.slane %v240_v26, 2  ;;  %v247_v29 = vadd.f32 %v246_v27, %v245_v25 }
 0x139   :  { %v242_v30 = vadd.f32 %v241_v28, %v240_v26  ;;  %v248_v31 = vrot.slane %v247_v29, 2 }
 0x13b   :  { %v243_v32 = vrot.slane %v242_v30, 1  ;;  %v249_v33 = vadd.f32 %v248_v31, %v247_v29 }
 0x13d   :  { %v244_v34 = vadd.f32 %v243_v32, %v242_v30  ;;  %v250_v35 = vrot.slane %v249_v33, 1 }
 0x13f   :  { %v251_v36 = vadd.f32 %v250_v35, %v249_v33  ;;  %v252_v37 = vmul.f32 0.125, %v244_v34 }
 0x141   :  { %v253_v38 = vmul.f32 0.125, %v251_v36  ;;  %v254_v39 = vmul.f32 %v252_v37, %v252_v37  ;;  %v259_v43 = vsub.f32 %v234_v23, %v252_v37  ;;  %v719_v36 = vld [vmem:[#allocation7 + $0x2] ss:$0 sm:$0xff] }
 0x143   :  { %v255_v40 = vsub.f32 %v253_v38, %v254_v39  ;;  %v720_v38 = vld [vmem:[#allocation7 + $0x3] ss:$0 sm:$0xff] }
 0x145   :  { %v256_v41 = vmax.f32 %v255_v40, 0.0 }
 0x147   :  { %v257_v42 = vadd.f32 1e-05, %v256_v41 }
 0x149   :  { %1120 = vrsqrt.f32 %v257_v42  ;;  %v514_v42 = vld [vmem:[#allocation5 + $0x210] sm:$0xff] }
 0x153   :  { %v1121_v44 = vpop.eup %1120 }
 0x154   :  { %v260_v46 = vmul.f32 %v1121_v44, %v259_v43  ;;  %v515_v43 = vld [vmem:[#allocation5 + $0x218] sm:$0xff] }
 0x155   :  { %v1063_v44 = vpack.c.bf16 %v515_v43, %v514_v42 }
 0x156   :  { %v265_v48 = vmul.f32 %v717_v45, %v260_v46  ;;  %v516_v45 = vld [vmem:[#allocation5 + $0x220] sm:$0xff]  ;;  %v517_v46 = vld [vmem:[#allocation5 + $0x228] sm:$0xff] }
 0x158   :  { %v270_v49 = vadd.f32 %v718_v47, %v265_v48  ;;  %v1066_v47 = vpack.c.bf16 %v517_v46, %v516_v45  ;;  %v518_v48 = vld [vmem:[#allocation5 + $0x230] sm:$0xff] }
 0x159   :  { %v721_v46 = vld [vmem:[#allocation7 + $0x4] ss:$0 sm:$0xff] }
 0x15a   :  { %v271_v50 = vmax.f32 %v270_v49, 0.0  ;;  %v519_v49 = vld [vmem:[#allocation5 + $0x238] sm:$0xff] }
 0x15c   :  { %871 = vmatmul.mubr.f32.vlgmr.msra.gmra.mrb[2].mxu1 %v271_v50  ;;  %v1069_v50 = vpack.c.bf16 %v519_v49, %v518_v48  ;;  %v722_v48 = vld [vmem:[#allocation7 + $0x5] ss:$0 sm:$0xff] }
 0x15d   :  { %940 = vmatprep.mubr.msk.f32.mxu1 %vm1226_vm0, %v1227_v1  ;;  %1064 = vmatpush3.bf16.msra.mxu1 %v1063_v44 }
 0x15e   :  { %1065 = vmatprep.subr.bf16.mxu1 %v1225_v0 }
 0x161   :  { %1067 = vmatpush3.bf16.msra.mxu1 %v1066_v47 }
 0x162   :  { %1068 = vmatprep.subr.bf16.mxu1 %v1225_v0 }
 0x165   :  { %1070 = vmatpush3.bf16.msra.mxu1 %v1069_v50 }
 0x166   :  { %1071 = vmatprep.subr.bf16.mxu1 %v1225_v0 }
 0x22f   :  { %v354_v13 = vpop.f32.mrb[2].mxu1 }
 0x230   :  { %v360_v14 = vrot.slane %v354_v13, 4  ;;  %v366_v15 = vmul.f32 %v354_v13, %v354_v13  ;;  %v872_v16 = vpop.f32.mrb[3].mxu1 }
 0x231   :  { %v615_v16 = vld [vmem:[#allocation5 + $0x2d8] sm:$0xff] }
 0x232   :  { %v361_v17 = vadd.f32 %v360_v14, %v354_v13  ;;  %v367_v18 = vrot.slane %v366_v15, 4 }
 0x234   :  { %v362_v19 = vrot.slane %v361_v17, 2  ;;  %v368_v20 = vadd.f32 %v367_v18, %v366_v15  ;;  %v614_v15 = vld [vmem:[#allocation5 + $0x2d0] sm:$0xff]  ;;  %v616_v18 = vld [vmem:[#allocation5 + $0x2e0] sm:$0xff] }
 0x236   :  { %v363_v21 = vadd.f32 %v362_v19, %v361_v17  ;;  %v369_v22 = vrot.slane %v368_v20, 2  ;;  %v1099_v17 = vpack.c.bf16 %v615_v16, %v614_v15  ;;  %v617_v19 = vld [vmem:[#allocation5 + $0x2e8] sm:$0xff] }
 0x238   :  { %v364_v23 = vrot.slane %v363_v21, 1  ;;  %v370_v24 = vadd.f32 %v369_v22, %v368_v20  ;;  %v1102_v20 = vpack.c.bf16 %v617_v19, %v616_v18  ;;  %v619_v22 = vld [vmem:[#allocation5 + $0x2f8] sm:$0xff] }
 0x23a   :  { %v365_v25 = vadd.f32 %v364_v23, %v363_v21  ;;  %v371_v26 = vrot.slane %v370_v24, 1  ;;  %v618_v21 = vld [vmem:[#allocation5 + $0x2f0] sm:$0xff] }
 0x23b   :  { %v1105_v23 = vpack.c.bf16 %v619_v22, %v618_v21 }
 0x23c   :  { %v372_v27 = vadd.f32 %v371_v26, %v370_v24  ;;  %v373_v28 = vmul.f32 0.125, %v365_v25 }
 0x23e   :  { %v374_v29 = vmul.f32 0.125, %v372_v27  ;;  %v375_v30 = vmul.f32 %v373_v28, %v373_v28  ;;  %v380_v34 = vsub.f32 %v354_v13, %v373_v28  ;;  %v613_v13 = vld [vmem:[#allocation5 + $0x2c8] sm:$0xff] }
 0x23f   :  { %v1096_v14 = vpack.c.bf16 %v613_v13, %v612_v12 }
 0x240   :  { %v376_v31 = vsub.f32 %v374_v29, %v375_v30 }
 0x242   :  { %v377_v32 = vmax.f32 %v376_v31, 0.0 }
 0x244   :  { %v378_v33 = vadd.f32 1e-05, %v377_v32 }
 0x246   :  { %1122 = vrsqrt.f32 %v378_v33 }
 0x250   :  { %v1123_v35 = vpop.eup %1122 }
 0x251   :  { %v381_v37 = vmul.f32 %v1123_v35, %v380_v34 }
 0x253   :  { %v386_v39 = vmul.f32 %v719_v36, %v381_v37 }
 0x255   :  { %v391_v40 = vadd.f32 %v720_v38, %v386_v39 }
 0x257   :  { %v392_v41 = vmax.f32 %v391_v40, 0.0 }
 0x259   :  { %906 = vmatmul.mubr.f32.vlgmr.msra.gmra.mrb[2].mxu0 %v392_v41 }
 0x25a   :  { %975 = vmatprep.mubr.msk.f32.mxu0 %vm1226_vm0, %v1227_v1  ;;  %v521_v1 = vld [vmem:[#allocation5 + $0x248] sm:$0xff]  ;;  %1088 = vmatpush3.bf16.msra.mxu0 %v1087_v6 }
 0x25b   :  { %v1072_v52 = vpack.c.bf16 %v521_v1, %v520_v51  ;;  %1089 = vmatprep.subr.bf16.mxu0 %v1225_v0  ;;  %v620_v1 = vld [vmem:[#allocation5 + $0x300] sm:$0xff] }
 0x25d   :  { %1073 = vmatpush3.bf16.msra.mxu1 %v1072_v52  ;;  %v621_v52 = vld [vmem:[#allocation5 + $0x308] sm:$0xff] }
 0x25e   :  { %1074 = vmatprep.subr.bf16.mxu1 %v1225_v0  ;;  %1091 = vmatpush3.bf16.msra.mxu0 %v1090_v8  ;;  %v1108_v53 = vpack.c.bf16 %v621_v52, %v620_v1 }
 0x25f   :  { %1092 = vmatprep.subr.bf16.mxu0 %v1225_v0 }
 0x261   :  { %1076 = vmatpush3.bf16.msra.mxu1 %v1075_v55 }
 0x262   :  { %1077 = vmatprep.subr.bf16.mxu1 %v1225_v0  ;;  %1094 = vmatpush3.bf16.msra.mxu0 %v1093_v11 }
 0x263   :  { %1095 = vmatprep.subr.bf16.mxu0 %v1225_v0 }
 0x265   :  { %1079 = vmatpush3.bf16.msra.mxu1 %v1078_v58 }
 0x266   :  { %1080 = vmatprep.subr.bf16.mxu1 %v1225_v0  ;;  %1097 = vmatpush3.bf16.msra.mxu0 %v1096_v14 }
 0x267   :  { %1098 = vmatprep.subr.bf16.mxu0 %v1225_v0 }
 0x269   :  { %1082 = vmatpush3.bf16.msra.mxu1 %v1081_v61 }
 0x26a   :  { %1083 = vmatprep.subr.bf16.mxu1 %v1225_v0  ;;  %1100 = vmatpush3.bf16.msra.mxu0 %v1099_v17 }
 0x26b   :  { %1101 = vmatprep.subr.bf16.mxu0 %v1225_v0 }
 0x26d   :  { %1085 = vmatpush3.bf16.msra.mxu1 %v1084_v2 }
 0x26e   :  { %1103 = vmatpush3.bf16.msra.mxu0 %v1102_v20 }
 0x26f   :  { %1104 = vmatprep.subr.bf16.mxu0 %v1225_v0 }
 0x272   :  { %1106 = vmatpush3.bf16.msra.mxu0 %v1105_v23 }
 0x273   :  { %1107 = vmatprep.subr.bf16.mxu0 %v1225_v0 }
 0x276   :  { %1109 = vmatpush3.bf16.msra.mxu0 %v1108_v53 }
 0x32c   :  { %v475_v24 = vpop.f32.mrb[2].mxu0 }
 0x32d   :  { %v481_v25 = vrot.slane %v475_v24, 4  ;;  %v487_v26 = vmul.f32 %v475_v24, %v475_v24  ;;  %v907_v27 = vpop.f32.mrb[3].mxu0 }
 0x32f   :  { %v482_v28 = vadd.f32 %v481_v25, %v475_v24  ;;  %v488_v29 = vrot.slane %v487_v26, 4 }
 0x331   :  { %v483_v30 = vrot.slane %v482_v28, 2  ;;  %v489_v31 = vadd.f32 %v488_v29, %v487_v26 }
 0x333   :  { %v484_v32 = vadd.f32 %v483_v30, %v482_v28  ;;  %v490_v33 = vrot.slane %v489_v31, 2 }
 0x335   :  { %v485_v34 = vrot.slane %v484_v32, 1  ;;  %v491_v35 = vadd.f32 %v490_v33, %v489_v31 }
 0x337   :  { %v486_v36 = vadd.f32 %v485_v34, %v484_v32  ;;  %v492_v37 = vrot.slane %v491_v35, 1 }
 0x339   :  { %v493_v38 = vadd.f32 %v492_v37, %v491_v35  ;;  %v494_v39 = vmul.f32 0.125, %v486_v36 }
 0x33b   :  { %v495_v40 = vmul.f32 0.125, %v493_v38  ;;  %v496_v41 = vmul.f32 %v494_v39, %v494_v39  ;;  %v501_v44 = vsub.f32 %v475_v24, %v494_v39 }
 0x33d   :  { %v497_v42 = vsub.f32 %v495_v40, %v496_v41 }
 0x33f   :  { %v498_v0 = vmax.f32 %v497_v42, 0.0 }
 0x341   :  { %v499_v43 = vadd.f32 1e-05, %v498_v0 }
 0x343   :  { %1124 = vrsqrt.f32 %v499_v43 }
 0x34d   :  { %v1125_v45 = vpop.eup %1124 }
 0x34e   :  { %v502_v47 = vmul.f32 %v1125_v45, %v501_v44 }
 0x350   :  { %v507_v49 = vmul.f32 %v721_v46, %v502_v47 }
 0x352   :  { %v512_v50 = vadd.f32 %v722_v48, %v507_v49 }
 0x354   :  { %v513_v51 = vmax.f32 %v512_v50, 0.0 }
 0x356   :  { %941 = vmatmul.mubr.f32.vlgmr.msra.gmra.mrb[4].mxu1 %v513_v51 }
 0x429   :  { %v601_v55 = vpop.f32.mrb[4].mxu1 }
 0x42a   :  { %v602_v56 = vadd.f32 %v723_v54, %v601_v55  ;;  %v942_v57 = vpop.f32.mrb[5].mxu1 }
 0x42c   :  { %v605_v58 = vmax.f32 %v602_v56, 0.0 }
 0x42e   :  { %976 = vmatmul.mubr.f32.vlgmr.msra.gmra.mrb[4].mxu0 %v605_v58 }
 0x501   :  { %v693_v60 = vpop.f32.mrb[4].mxu0 }
 0x502   :  { %v694_v61 = vadd.f32 %v724_v59, %v693_v60  ;;  %v977_v62 = vpop.f32.mrb[5].mxu0 }
 0x504   :  { %698 = vst.msk [vmem:[#allocation8] sm:$0xff] %vm697_vm5, %v694_v61 }
 0x505   :  { %1203 = shalt.err (!%p1200_p0)
}
 0x506   :  { %s1204_s25 = scalar_lea.hbm %s1344_s3, 128 }
 0x507   :  { %p1205_p1 = scmp.ne.s32.totalorder %s1344_s3, %s1204_s25  ;;  %p1208_p2 = scmp.lt.u32.totalorder %s1204_s25, %s1344_s3 }
 0x509   :  { %p1210_p3 = pnand %p1208_p2, %p1205_p1 }
 0x50b   :  { %1213 = shalt.err (!%p1210_p3)
}
 0x50c   :  { %708 = dma.vmem_to_hbm [thread:$0]  %s706_s21, 128, %s1344_s3, [#allocation4]  }
 0x50d   :  { %1218 = dma.done.wait [#allocation4], 128  }
 0x50e   :  { %1219 = vsyncadd [#allocation4], 4294967168 }
 0x50f   :  { %712 = vsyncpa [#allocation3], 1 }
 0x510   :  { %713 = vsyncpa [#allocation6], 1 }
 0x511   :  { %714 = vsyncpa [#allocation4], 1 }

</bundles_post_ra>
